<compile_context>
chip_gen: v6e
topology: v6e:2x2x1
jax: 0.10.0
libtpu: 0.0.40
codegen_flags: <defaults>
</compile_context>

<pallas_src>
import functools

import jax
import jax.numpy as jnp
from jax import lax
from jax.experimental import pallas as pl
from jax.experimental.pallas import tpu as pltpu

LN_EPS = 1e-12
_INV_SQRT2 = 0.7071067811865476


def _round_up(x, m):
    return (x + m - 1) // m * m


def _default_tiles():
    """Generation-conditional tile defaults (trace-time only)."""
    try:
        kind = jax.devices()[0].device_kind.lower()
    except Exception:  # pragma: no cover - defensive
        kind = ""
    if "v6" in kind:
        # v6e ridge ~700 FLOPs/byte -> want TM ~= 1024 on the decoder matmul.
        return 1024, 1024
    # v5e / v7x: TM ~= 512 is comfortably past the ridge; 128-aligned for MXU.
    return 512, 1024


def _heads_kernel(x_ref, dw_ref, db_ref, g_ref, b_ref, decw_ref, decb_ref,
                  out_ref, h_scratch):
    # Grid: (i = row tile, j = vocab tile). Vocab axis is innermost and
    # sequential, so the j == 0 transform fills scratch before any reuse.
    @pl.when(pl.program_id(1) == 0)
    def _():
        # In-kernel activation cast (f32 tile -> bf16) avoids a separate HBM
        # pass over x in the wrapper; x's index_map ignores j so the f32 DMA
        # is paid once per row tile.
        x = x_ref[...].astype(dw_ref.dtype)
        # dense: (TM,H) @ (H,H), bf16 operands, f32 accumulation on the MXU.
        h = jnp.dot(x, dw_ref[...], preferred_element_type=jnp.float32)
        h = h + db_ref[...]
        # exact gelu (erf form), matching torch.nn.functional.gelu default.
        h = 0.5 * h * (1.0 + lax.erf(h * _INV_SQRT2))
        # LayerNorm over last dim (biased variance, like torch.nn.LayerNorm).
        mean = jnp.mean(h, axis=-1, keepdims=True)
        var = jnp.mean(jnp.square(h - mean), axis=-1, keepdims=True)
        h = (h - mean) * lax.rsqrt(var + LN_EPS)
        h = h * g_ref[...] + b_ref[...]
        h_scratch[...] = h.astype(h_scratch.dtype)

    # decoder tile: (TM,H) @ (H,TV) + bias, f32 accumulate, cast to out dtype.
    scores = jnp.dot(h_scratch[...], decw_ref[...],
                     preferred_element_type=jnp.float32)
    out_ref[...] = (scores + decb_ref[...]).astype(out_ref.dtype)
    # TODO(synk): optionally software-pipeline the transform of row tile i+1
    # into a second scratch buffer during the last vocab steps of tile i.


def wwm_bert_pretraining_heads(sequence_output, params, *, vocab_size,
                               row_tile=None, vocab_tile=None,
                               out_dtype=jnp.bfloat16):
    """sequence_output: (B, S, H) -> prediction_scores: (B, S, vocab_size).

    `params` must come from prepare_params (weights pre-transposed to
    (in, out), pre-cast to the compute dtype, decoder padded on the vocab
    dim).  `vocab_size` is the logical (unpadded) vocab size and must be a
    static Python int (bind it with functools.partial before jit).
    """
    B, S, H = sequence_output.shape
    Vp = params["decoder_w"].shape[1]          # padded vocab
    V = vocab_size
    compute_dtype = params["dense_w"].dtype

    if row_tile is None or vocab_tile is None:
        d_rt, d_vt = _default_tiles()
        row_tile = d_rt if row_tile is None else row_tile
        vocab_tile = d_vt if vocab_tile is None else vocab_tile
    assert row_tile % 16 == 0, "row_tile must be a multiple of 16 (bf16 sublanes)"
    assert vocab_tile % 128 == 0, "vocab_tile must be a multiple of 128 (lanes)"

    M = B * S
    TM = min(row_tile, _round_up(M, 16))
    Mp = _round_up(M, TM)
    TV = min(vocab_tile, Vp)
    assert Vp % TV == 0, (
        "decoder_w padded vocab dim must be a multiple of vocab_tile; "
        "pad with prepare_params(vocab_pad_multiple=...) consistently")

    # Activation stays in its input dtype; only the (cheap) row pad happens
    # here, and only when M is not already a multiple of TM.
    x2d = sequence_output.reshape(M, H)
    if Mp != M:
        x2d = jnp.pad(x2d, ((0, Mp - M), (0, 0)))

    grid = (Mp // TM, Vp // TV)

    out2d = pl.pallas_call(
        _heads_kernel,
        out_shape=jax.ShapeDtypeStruct((Mp, Vp), out_dtype),
        grid_spec=pltpu.PrefetchScalarGridSpec(
            num_scalar_prefetch=0,
            grid=grid,
            in_specs=[
                pl.BlockSpec((TM, H), lambda i, j: (i, 0)),    # x row tile (orig dtype)
                pl.BlockSpec((H, H), lambda i, j: (0, 0)),     # dense_w (in,out)
                pl.BlockSpec((1, H), lambda i, j: (0, 0)),     # dense_b
                pl.BlockSpec((1, H), lambda i, j: (0, 0)),     # ln gamma
                pl.BlockSpec((1, H), lambda i, j: (0, 0)),     # ln beta
                pl.BlockSpec((H, TV), lambda i, j: (0, j)),    # decoder_w tile
                pl.BlockSpec((1, TV), lambda i, j: (0, j)),    # decoder bias tile
            ],
            out_specs=pl.BlockSpec((TM, TV), lambda i, j: (i, j)),
            scratch_shapes=[pltpu.VMEM((TM, H), compute_dtype)],
        ),
        compiler_params=pltpu.CompilerParams(
            # Row axis shards across TensorCores (megacore); vocab axis MUST
            # stay sequential ("arbitrary") so the j==0 transform fills the
            # scratch before later vocab tiles read it.
            dimension_semantics=("parallel", "arbitrary"),
            # Safe on v7x (64 MiB physical) and well under v5e/v6e's 128 MiB.
            vmem_limit_bytes=48 * 1024 * 1024,
        ),
    )(x2d, params["dense_w"], params["dense_b"], params["ln_gamma"],
      params["ln_beta"], params["decoder_w"], params["decoder_bias"])

    return out2d[:M, :V].reshape(B, S, V)


def init_params(key, hidden_size, vocab_size):
    """Logical f32 params; matmul weights stored (in, out) — i.e. a torch
    checkpoint's (out, in) weights would be transposed once at load time."""
    k1, k2, k3, k4 = jax.random.split(key, 4)
    scale = 0.02
    return {
        "dense_w": scale * jax.random.normal(
            k1, (hidden_size, hidden_size), jnp.float32),
        "dense_b": scale * jax.random.normal(k2, (hidden_size,), jnp.float32),
        "ln_gamma": jnp.ones((hidden_size,), jnp.float32),
        "ln_beta": jnp.zeros((hidden_size,), jnp.float32),
        "decoder_w": scale * jax.random.normal(
            k3, (hidden_size, vocab_size), jnp.float32),
        # torch init is zeros; use small values so the bias add is exercised
        "decoder_bias": scale * jax.random.normal(k4, (vocab_size,), jnp.float32),
    }


def prepare_params(params_f32, *, vocab_pad_multiple=1024,
                   compute_dtype=jnp.bfloat16):
    """One-time (checkpoint-load-time) prep: cast matmul weights to the compute
    dtype and pad the vocab dim, so the per-call path does no HBM-sized
    pad/astype work.  Returns (prepared_params, logical_vocab_size)."""
    H = params_f32["dense_w"].shape[0]
    V = params_f32["decoder_w"].shape[1]
    Vp = _round_up(V, vocab_pad_multiple)
    dec_w = params_f32["decoder_w"].astype(compute_dtype)
    dec_b = params_f32["decoder_bias"].reshape(1, V).astype(jnp.float32)
    if Vp != V:
        dec_w = jnp.pad(dec_w, ((0, 0), (0, Vp - V)))
        dec_b = jnp.pad(dec_b, ((0, 0), (0, Vp - V)))
    prepared = {
        "dense_w": params_f32["dense_w"].astype(compute_dtype),
        "dense_b": params_f32["dense_b"].reshape(1, H).astype(jnp.float32),
        "ln_gamma": params_f32["ln_gamma"].reshape(1, H).astype(jnp.float32),
        "ln_beta": params_f32["ln_beta"].reshape(1, H).astype(jnp.float32),
        "decoder_w": dec_w,
        "decoder_bias": dec_b,
    }
    return prepared, V


def _reference(sequence_output, params_f32, compute_dtype=jnp.bfloat16):
    """Pure-JAX reference mirroring the kernel's bf16/f32 mixed precision."""
    x = sequence_output.astype(compute_dtype)
    h = jnp.dot(x, params_f32["dense_w"].astype(compute_dtype),
                preferred_element_type=jnp.float32)
    h = h + params_f32["dense_b"]
    h = 0.5 * h * (1.0 + lax.erf(h * _INV_SQRT2))
    mean = jnp.mean(h, axis=-1, keepdims=True)
    var = jnp.mean(jnp.square(h - mean), axis=-1, keepdims=True)
    h = (h - mean) * lax.rsqrt(var + LN_EPS)
    h = h * params_f32["ln_gamma"] + params_f32["ln_beta"]
    h = h.astype(compute_dtype)
    scores = jnp.dot(h, params_f32["decoder_w"].astype(compute_dtype),
                     preferred_element_type=jnp.float32)
    return scores + params_f32["decoder_bias"]


if __name__ == "__main__":
    # Small shapes; V deliberately NOT a multiple of the vocab tile to exercise
    # the pad-and-slice path, and M spans multiple row tiles in test 1.
    B, S, H, V = 2, 16, 32, 300
    key = jax.random.PRNGKey(0)
    kx, kp = jax.random.split(key)
    sequence_output = jax.random.normal(kx, (B, S, H), jnp.float32)
    params_f32 = init_params(kp, H, V)

    # 1) multi-tile run (2 row tiles x 3 vocab tiles) with f32 logits for a
    #    tight correctness check against the mixed-precision reference.
    prepared_small, vocab_size = prepare_params(params_f32, vocab_pad_multiple=128)
    heads_f32 = jax.jit(functools.partial(
        wwm_bert_pretraining_heads, vocab_size=vocab_size,
        row_tile=16, vocab_tile=128, out_dtype=jnp.float32))
    scores = jax.block_until_ready(heads_f32(sequence_output, prepared_small))
    ref = _reference(sequence_output, params_f32)
    assert scores.shape == (B, S, V)
    assert jnp.allclose(scores, ref, atol=5e-3, rtol=5e-3), "mismatch vs reference"

    # 2) default perf-shaped path (generation-default tiles, bf16 logits) —
    #    shape / dtype / finiteness check.
    prepared, vocab_size = prepare_params(params_f32)
    heads = jax.jit(functools.partial(
        wwm_bert_pretraining_heads, vocab_size=vocab_size))
    scores_bf16 = jax.block_until_ready(heads(sequence_output, prepared))
    assert scores_bf16.shape == (B, S, V)
    assert scores_bf16.dtype == jnp.bfloat16
    assert bool(jnp.all(jnp.isfinite(scores_bf16.astype(jnp.float32))))

    print("KERNEL_OK")
</pallas_src>

<mosaic_0001>
module attributes {stable_mosaic.version = 11 : i64} {
  func.func @_heads_kernel(%arg0: i32, %arg1: i32, %arg2: memref<16x32xf32, #tpu.memory_space<vmem>>, %arg3: memref<32x32xbf16, #tpu.memory_space<vmem>>, %arg4: memref<1x32xf32, #tpu.memory_space<vmem>>, %arg5: memref<1x32xf32, #tpu.memory_space<vmem>>, %arg6: memref<1x32xf32, #tpu.memory_space<vmem>>, %arg7: memref<32x128xbf16, #tpu.memory_space<vmem>>, %arg8: memref<1x128xf32, #tpu.memory_space<vmem>>, %arg9: memref<16x128xf32, #tpu.memory_space<vmem>>, %arg10: memref<16x32xbf16, #tpu.memory_space<vmem>>) attributes {dimension_semantics = [#tpu.dimension_semantics<parallel>, #tpu.dimension_semantics<arbitrary>], iteration_bounds = array<i64: 2, 3>, scalar_prefetch = 0 : i64, scratch_operands = 1 : i64, tpu.core_type = #tpu.core_type<tc>, window_params = [{transform_indices = @transform_0, window_bounds = array<i64: 16, 32>}, {pipeline_mode = #tpu.pipeline_mode<synchronous>, transform_indices = @transform_1, window_bounds = array<i64: 32, 32>}, {pipeline_mode = #tpu.pipeline_mode<synchronous>, transform_indices = @transform_2, window_bounds = array<i64: 1, 32>}, {pipeline_mode = #tpu.pipeline_mode<synchronous>, transform_indices = @transform_3, window_bounds = array<i64: 1, 32>}, {pipeline_mode = #tpu.pipeline_mode<synchronous>, transform_indices = @transform_4, window_bounds = array<i64: 1, 32>}, {transform_indices = @transform_5, window_bounds = array<i64: 32, 128>}, {transform_indices = @transform_6, window_bounds = array<i64: 1, 128>}, {transform_indices = @transform_7, window_bounds = array<i64: 16, 128>}]} {
    %c0_i32 = arith.constant 0 : i32
    %0 = arith.cmpi eq, %arg1, %c0_i32 : i32
    %1 = arith.extui %0 : i1 to i32
    %c0_i32_0 = arith.constant 0 : i32
    %2 = arith.cmpi ne, %1, %c0_i32_0 : i32
    scf.if %2 {
      %c0_8 = arith.constant 0 : index
      %c0_9 = arith.constant 0 : index
      %10 = vector.load %arg2[%c0_8, %c0_9] : memref<16x32xf32, #tpu.memory_space<vmem>>, vector<16x32xf32>
      %11 = arith.truncf %10 : vector<16x32xf32> to vector<16x32xbf16>
      %c0_10 = arith.constant 0 : index
      %c0_11 = arith.constant 0 : index
      %12 = vector.load %arg3[%c0_10, %c0_11] : memref<32x32xbf16, #tpu.memory_space<vmem>>, vector<32x32xbf16>
      %cst_12 = arith.constant dense<0.000000e+00> : vector<16x32xf32>
      %13 = tpu.matmul %11, %12, %cst_12 {dimension_numbers = #tpu.dot_dimension_numbers<[1], [0], [0], [1], [0, 0, 1, 1], [], []>} : vector<16x32xbf16>, vector<32x32xbf16>, vector<16x32xf32> -> vector<16x32xf32>
      %c0_13 = arith.constant 0 : index
      %c0_14 = arith.constant 0 : index
      %14 = vector.load %arg4[%c0_13, %c0_14] : memref<1x32xf32, #tpu.memory_space<vmem>>, vector<1x32xf32>
      %15 = vector.broadcast %14 : vector<1x32xf32> to vector<16x32xf32>
      %16 = arith.addf %13, %15 : vector<16x32xf32>
      %cst_15 = arith.constant 5.000000e-01 : f32
      %17 = vector.broadcast %cst_15 : f32 to vector<16x32xf32>
      %18 = arith.mulf %17, %16 : vector<16x32xf32>
      %cst_16 = arith.constant 0.707106769 : f32
      %19 = vector.broadcast %cst_16 : f32 to vector<16x32xf32>
      %20 = arith.mulf %16, %19 : vector<16x32xf32>
      %21 = math.erf %20 : vector<16x32xf32>
      %cst_17 = arith.constant 1.000000e+00 : f32
      %22 = vector.broadcast %cst_17 : f32 to vector<16x32xf32>
      %23 = arith.addf %22, %21 : vector<16x32xf32>
      %24 = arith.mulf %18, %23 : vector<16x32xf32>
      %cst_18 = arith.constant dense<0.000000e+00> : vector<16xf32>
      %25 = vector.multi_reduction <add>, %24, %cst_18 [1] : vector<16x32xf32> to vector<16xf32>
      %26 = vector.shape_cast %25 : vector<16xf32> to vector<16x1xf32>
      %cst_19 = arith.constant 3.200000e+01 : f32
      %27 = vector.broadcast %cst_19 : f32 to vector<16x1xf32>
      %28 = arith.divf %26, %27 : vector<16x1xf32>
      %29 = vector.broadcast %28 : vector<16x1xf32> to vector<16x32xf32>
      %30 = arith.subf %24, %29 : vector<16x32xf32>
      %31 = arith.mulf %30, %30 : vector<16x32xf32>
      %cst_20 = arith.constant dense<0.000000e+00> : vector<16xf32>
      %32 = vector.multi_reduction <add>, %31, %cst_20 [1] : vector<16x32xf32> to vector<16xf32>
      %33 = vector.shape_cast %32 : vector<16xf32> to vector<16x1xf32>
      %cst_21 = arith.constant 3.200000e+01 : f32
      %34 = vector.broadcast %cst_21 : f32 to vector<16x1xf32>
      %35 = arith.divf %33, %34 : vector<16x1xf32>
      %36 = vector.broadcast %28 : vector<16x1xf32> to vector<16x32xf32>
      %37 = arith.subf %24, %36 : vector<16x32xf32>
      %cst_22 = arith.constant 9.99999996E-13 : f32
      %38 = vector.broadcast %cst_22 : f32 to vector<16x1xf32>
      %39 = arith.addf %35, %38 : vector<16x1xf32>
      %40 = math.rsqrt %39 : vector<16x1xf32>
      %41 = vector.broadcast %40 : vector<16x1xf32> to vector<16x32xf32>
      %42 = arith.mulf %37, %41 : vector<16x32xf32>
      %c0_23 = arith.constant 0 : index
      %c0_24 = arith.constant 0 : index
      %43 = vector.load %arg5[%c0_23, %c0_24] : memref<1x32xf32, #tpu.memory_space<vmem>>, vector<1x32xf32>
      %44 = vector.broadcast %43 : vector<1x32xf32> to vector<16x32xf32>
      %45 = arith.mulf %42, %44 : vector<16x32xf32>
      %c0_25 = arith.constant 0 : index
      %c0_26 = arith.constant 0 : index
      %46 = vector.load %arg6[%c0_25, %c0_26] : memref<1x32xf32, #tpu.memory_space<vmem>>, vector<1x32xf32>
      %47 = vector.broadcast %46 : vector<1x32xf32> to vector<16x32xf32>
      %48 = arith.addf %45, %47 : vector<16x32xf32>
      %49 = arith.truncf %48 : vector<16x32xf32> to vector<16x32xbf16>
      %c0_27 = arith.constant 0 : index
      %c0_28 = arith.constant 0 : index
      %50 = vector.load %arg10[%c0_27, %c0_28] : memref<16x32xbf16, #tpu.memory_space<vmem>>, vector<16x32xbf16>
      tpu.vector_store %arg10[%c0_27, %c0_28], %49 {strides = array<i32>} : memref<16x32xbf16, #tpu.memory_space<vmem>>, vector<16x32xbf16>,
    } else {
    }
    %c0 = arith.constant 0 : index
    %c0_1 = arith.constant 0 : index
    %3 = vector.load %arg10[%c0, %c0_1] : memref<16x32xbf16, #tpu.memory_space<vmem>>, vector<16x32xbf16>
    %c0_2 = arith.constant 0 : index
    %c0_3 = arith.constant 0 : index
    %4 = vector.load %arg7[%c0_2, %c0_3] : memref<32x128xbf16, #tpu.memory_space<vmem>>, vector<32x128xbf16>
    %cst = arith.constant dense<0.000000e+00> : vector<16x128xf32>
    %5 = tpu.matmul %3, %4, %cst {dimension_numbers = #tpu.dot_dimension_numbers<[1], [0], [0], [1], [0, 0, 1, 1], [], []>} : vector<16x32xbf16>, vector<32x128xbf16>, vector<16x128xf32> -> vector<16x128xf32>
    %c0_4 = arith.constant 0 : index
    %c0_5 = arith.constant 0 : index
    %6 = vector.load %arg8[%c0_4, %c0_5] : memref<1x128xf32, #tpu.memory_space<vmem>>, vector<1x128xf32>
    %7 = vector.broadcast %6 : vector<1x128xf32> to vector<16x128xf32>
    %8 = arith.addf %5, %7 : vector<16x128xf32>
    %c0_6 = arith.constant 0 : index
    %c0_7 = arith.constant 0 : index
    %9 = vector.load %arg9[%c0_6, %c0_7] : memref<16x128xf32, #tpu.memory_space<vmem>>, vector<16x128xf32>
    tpu.vector_store %arg9[%c0_6, %c0_7], %8 {strides = array<i32>} : memref<16x128xf32, #tpu.memory_space<vmem>>, vector<16x128xf32>,
    return
  }
  func.func @transform_0(%arg0: i32, %arg1: i32) -> (i32, i32) {
    %c0_i32 = arith.constant 0 : i32
    %c0_i32_0 = arith.constant 0 : i32
    return %arg0, %c0_i32 : i32, i32
  }
  func.func @transform_1(%arg0: i32, %arg1: i32) -> (i32, i32) {
    %c0_i32 = arith.constant 0 : i32
    %c0_i32_0 = arith.constant 0 : i32
    %c0_i32_1 = arith.constant 0 : i32
    return %c0_i32, %c0_i32_0 : i32, i32
  }
  func.func @transform_2(%arg0: i32, %arg1: i32) -> (i32, i32) {
    %c0_i32 = arith.constant 0 : i32
    %c0_i32_0 = arith.constant 0 : i32
    %c0_i32_1 = arith.constant 0 : i32
    return %c0_i32, %c0_i32_0 : i32, i32
  }
  func.func @transform_3(%arg0: i32, %arg1: i32) -> (i32, i32) {
    %c0_i32 = arith.constant 0 : i32
    %c0_i32_0 = arith.constant 0 : i32
    %c0_i32_1 = arith.constant 0 : i32
    return %c0_i32, %c0_i32_0 : i32, i32
  }
  func.func @transform_4(%arg0: i32, %arg1: i32) -> (i32, i32) {
    %c0_i32 = arith.constant 0 : i32
    %c0_i32_0 = arith.constant 0 : i32
    %c0_i32_1 = arith.constant 0 : i32
    return %c0_i32, %c0_i32_0 : i32, i32
  }
  func.func @transform_5(%arg0: i32, %arg1: i32) -> (i32, i32) {
    %c0_i32 = arith.constant 0 : i32
    %c0_i32_0 = arith.constant 0 : i32
    return %c0_i32, %arg1 : i32, i32
  }
  func.func @transform_6(%arg0: i32, %arg1: i32) -> (i32, i32) {
    %c0_i32 = arith.constant 0 : i32
    %c0_i32_0 = arith.constant 0 : i32
    return %c0_i32, %arg1 : i32, i32
  }
  func.func @transform_7(%arg0: i32, %arg1: i32) -> (i32, i32) {
    %c0_i32 = arith.constant 0 : i32
    return %arg0, %arg1 : i32, i32
  }
}

</mosaic_0001>

<bundles_post_ra>
// kernel: wwm_bert_pretraining_heads.1
= control target key start
LH: loop header
LB: loop body
LE: loop exit
PB: predicated region body
PF: predicated region fallthrough
CT: control target
= control target key end

     0   :  { %s1615_s0 = inlined_call_operand.hbm [shape: f32[32,32], index: 0, kind: input, shape index: {}]   ;;  %s1616_s1 = inlined_call_operand.hbm [shape: bf16[32,32], index: 1, kind: input, shape index: {}]   ;;  %s1617_s2 = inlined_call_operand.vmem [shape: f32[1,32], index: 2, kind: input, shape index: {}]   ;;  %s1618_s3 = inlined_call_operand.vmem [shape: f32[1,32], index: 3, kind: input, shape index: {}]   ;;  %s1619_s4 = inlined_call_operand.vmem [shape: f32[1,32], index: 4, kind: input, shape index: {}]   ;;  %s1620_s5 = inlined_call_operand.hbm [shape: bf16[32,384], index: 5, kind: input, shape index: {}]   ;;  %s1621_s6 = inlined_call_operand.vmem [shape: f32[1,384], index: 6, kind: input, shape index: {}]   ;;  %s1622_s7 = inlined_call_operand.hbm [shape: f32[32,384], index: 7, kind: output, shape index: {}]  }
   0x1   :  { %1635 = sst [smem:[#allocation26_spill]] %s1615_s0 }
   0x2   :  { %1636 = sst [smem:[#allocation27_spill]] %s1616_s1 }
   0x3   :  { %1637 = sst [smem:[#allocation28_spill]] %s1617_s2 }
   0x4   :  { %1638 = sst [smem:[#allocation29_spill]] %s1618_s3 }
   0x5   :  { %1639 = sst [smem:[#allocation30_spill]] %s1619_s4 }
   0x6   :  { %1640 = sst [smem:[#allocation31_spill]] %s1620_s5 }
   0x7   :  { %1641 = sst [smem:[#allocation32_spill]] %s1621_s6 }
   0x8   :  { %1642 = sst [smem:[#allocation33_spill]] %s1622_s7 }
   0x9   :  { %12 = vsyncpa [#allocation4], 0 }
   0xa   :  { %14 = vsyncpa [#allocation4 + $0x1], 0 }
   0xb   :  { %15 = vsyncpa [#allocation7], 0 }
   0xc   :  { %16 = vsyncpa [#allocation5], 0 }
   0xd   :  { %18 = vsyncpa [#allocation5 + $0x1], 0  ;;  %s1258_s24 = smov 0   ;;  %s1260_s25 = smov 0  }
   0xe   :  { %s1262_s26 = smov 0   ;;  %s1264_s27 = smov 0  }
   0xf   :  { %s1266_s28 = smov 0   ;;  %s1268_s29 = smov 0  }
  0x10   :  { %s1270_s30 = smov 0   ;;  %s1272_s8 = smov 0  }
  0x11   :  { %s1274_s9 = smov 0   ;;  %s1276_s10 = smov 0  }
  0x12   :  { %s1278_s11 = smov 0   ;;  %s1280_s12 = smov 0  }
  0x13   :  { %s1282_s13 = smov 0   ;;  %s1284_s14 = smov 0  }
  0x14 LB: > { %1643 = sst [smem:[#allocation14_spill]] %s1156_s26  ;;  %s33_s15 = sadd.s32 1, %s1192_s12  ;;  %s1200_s14 = sphi %s1284_s14, %s24_s14   ;;  %s1196_s13 = sphi %s1282_s13, %s1694_s13   ;;  %s1192_s12 = sphi %s1280_s12, %s1693_s12   ;;  %s1188_s11 = sphi %s1278_s11, %s1692_s11   ;;  %s1184_s10 = sphi %s1276_s10, %s1691_s10   ;;  %s1180_s9 = sphi %s1274_s9, %s1701_s9   ;;  %s1176_s8 = sphi %s1272_s8, %s1700_s8   ;;  %s1172_s30 = sphi %s1270_s30, %s1699_s30   ;;  %s1168_s29 = sphi %s1268_s29, %s1688_s29   ;;  %s1164_s28 = sphi %s1266_s28, %s1698_s28   ;;  %s1160_s27 = sphi %s1264_s27, %s1697_s27   ;;  %s1156_s26 = sphi %s1262_s26, %s1686_s26   ;;  %s1152_s25 = sphi %s1260_s25, %s1696_s25   ;;  %s1148_s24 = sphi %s1258_s24, %s1695_s24  }
  0x15   : > { %1644 = sst [smem:[#allocation15_spill]] %s1168_s29  ;;  %s36_s16 = sadd.s32 1, %s1196_s13 }
  0x16   : > { %1645 = sst [smem:[#allocation16_spill]] %s1180_s9  ;;  %p34_p0 = scmp.ge.s32.totalorder %s33_s15, 3 }
  0x17   : > { %1646 = sst [smem:[#allocation17_spill]] %s1184_s10  ;;  %s43_s17 = sadd.s32 1, %s1180_s9 }
  0x18   : > { %1647 = sst [smem:[#allocation18_spill]] %s1188_s11  ;;  %p50_p1 = scmp.ne.s32.totalorder %s1180_s9, %s1176_s8 }
  0x19   : > { %1648 = sst [smem:[#allocation19_spill]] %s1192_s12  ;;  %p51_p2 = scmp.eq.s32.totalorder %s1200_s14, 0 }
  0x1a   : > { %1649 = sst [smem:[#allocation20_spill]] %s1196_s13  ;;  %s1703_s15 = smov (%p34_p0, %s33_s15), 0 }
  0x1b   : > { %1650 = sst [smem:[#allocation21_spill]] %s1703_s15  ;;  %s1705_s16 = smov (!%p34_p0, %s36_s16), %s1196_s13 }
  0x1c   : > { %p1339_p3 = por %p51_p2, %p50_p1  ;;  %s1345_s19 = ssub.s32 %s1192_s12, %s1703_s15 }
  0x1d   : > { %p38_p4 = scmp.ge.s32.totalorder %s1705_s16, 2  ;;  %p151_p5 = scmp.eq.s32.totalorder %s1345_s19, 0 }
  0x1e   : > { %s207_s20 = sadd.s32 1, %s1156_s26  ;;  %p825_p6 = scmp.lt.s32.totalorder %s1200_s14, 6 }
  0x1f   : > { %s1707_s16 = smov (%p38_p4, %s1705_s16), 0  ;;  %s266_s21 = sand.u32 1, %s1200_s14  }
  0x20   : > { %1652 = sst [smem:[#allocation22_spill]] %s1707_s16  ;;  %s40_s22 = ssub.s32 %s1196_s13, %s1707_s16 }
  0x21   : > { %p41_p7 = scmp.eq.s32.totalorder %s40_s22, 0  ;;  %s204_s23 = sor.u32 %s1345_s19, %s40_s22 }
  0x22   : > { %p205_p8 = scmp.eq.s32.totalorder %s204_s23, 0  ;;  %s268_s7 = sand.u32 1, %s1180_s9  }
  0x23   : > { %s1358_s11 = scalar_select %p41_p7, %s1180_s9, %s43_s17  }
  0x24   : > { %s1361_s15 = scalar_select %p205_p8, %s1156_s26, %s207_s20  }
  0x25   : > { %1653 = sst [smem:[#allocation23_spill]] %s1358_s11  ;;  %s743_s4 = sshll.u32 %s268_s7, 4 }
  0x26   : > { %1654 = sst [smem:[#allocation24_spill]] %s1361_s15  ;;  %s773_s3 = sshll.u32 %s1196_s13, 8 }
  0x27   : > { %s1655_s0 = sld [smem:[#allocation26_spill]]  ;;  %s270_s5 = scalar_lea.vmem [#allocation3], %s743_s4 }
  0x28   : > { %s277_s1 = sshll.u32 %s270_s5, 4  ;;  %p1371_p9 = pnand %p825_p6, %p1339_p3  ;;  %s278_s1 = int_to_ptr.vmem [resolvable:$true] %s277_s1 }
  0x29   : > { %s1375_s17 = scalar_lea.sflag [#allocation4], %s266_s21  ;;  %s979_s7 = scalar_lea.vmem %s278_s1, 256 }
  0x2a   : > { %p968_p10 = pneg %p1371_p9  ;;  %p980_p11 = scmp.ne.s32.totalorder %s278_s1, %s979_s7 }
  0x2b   : > { %s1202_s2 = smov [#allocation3]  }
  0x2c   : > { %p982_p12 = pnand %p980_p11, %p968_p10 }
  0x2d   : > { %s276_s10 = scalar_lea.hbm %s1655_s0, %s773_s3  ;;  %s984_s3 = sshll.u32 %s1202_s2, 4  ;;  %s985_s3 = int_to_ptr.vmem [resolvable:$false] %s984_s3 }
  0x2e   : > { %p983_p13 = pneg %p982_p12  ;;  %s986_s4 = scalar_lea.vmem %s985_s3, 512 }
  0x2f   : > { %p987_p0 = scmp.lt.s32.totalorder %s278_s1, %s985_s3  ;;  %p988_p1 = scmp.lt.s32.totalorder %s986_s4, %s979_s7 }
  0x31   : > { %p989_p3 = por %p988_p1, %p987_p0 }
  0x33   : > { %p990_p4 = pnand %p989_p3, %p983_p13 }
  0x35   : > { %993 = shalt.err (!%p990_p4)
}
  0x36   : > { %s1203_s5 = smov 128   ;;  %s1204_s6 = smov 8  }
  0x37   : > { %816 = dma.hbm_to_vmem [thread:$0]  (!%p1371_p9), %s276_s10, 256, %s278_s1, %s1375_s17, %s1203_s5, %s1203_s5, %s1204_s6  }
  0x38   : > { %s1383_s18 = sadd.s32 4294967295, %s1200_s14   ;;  %s739_s20 = sadd.s32 4294967294, %s1200_s14  }
  0x39   : > { %p56_p7 = scmp.ne.s32.totalorder %s1176_s8, %s1172_s30  ;;  %p1627_p8 = scmp.eq.s32.totalorder %s1383_s18, 0 }
  0x3a   : > { %s153_s21 = sadd.s32 1, %s1168_s29  ;;  %p160_p10 = scmp.ne.s32.totalorder %s1168_s29, %s1164_s28 }
  0x3b   : > { %p1394_p11 = por %p1627_p8, %p56_p7  ;;  %p166_p12 = scmp.ne.s32.totalorder %s1164_s28, %s1160_s27 }
  0x3c   : > { %s1403_s1 = scalar_select %p151_p5, %s1168_s29, %s153_s21  }
  0x3d   : > { %p1407_p9 = por %p160_p10, %p51_p2  ;;  %p1413_p13 = por %p166_p12, %p1627_p8 }
  0x3e   : > { %1658 = sst [smem:[#allocation25_spill]] %s1403_s1  ;;  %p217_p0 = scmp.ne.s32.totalorder %s1156_s26, %s1152_s25 }
  0x3f   : > { %s1660_s30 = scalar_select %p1413_p13, 1, 0 }
  0x40   : > { %p218_p1 = scmp.eq.s32.totalorder %s1383_s18, 5  ;;  %p223_p3 = scmp.ne.s32.totalorder %s1152_s25, %s1148_s24 }
  0x41   : > { %p224_p5 = scmp.eq.s32.totalorder %s739_s20, 5  ;;  %p740_p2 = scmp.ge.s32.totalorder %s1200_s14, 1 }
  0x42   : > { %p1422_p4 = por %p218_p1, %p217_p0  ;;  %p231_p10 = scmp.lt.s32.totalorder %s1200_s14, 7 }
  0x43   : > { %p1427_p7 = por %p224_p5, %p223_p3  ;;  %s1205_s23 = smov [#allocation6]  }
  0x44   : > { %s1661_s27 = scalar_select %p1422_p4, 1, 0 }
  0x45   : > { %s1662_s16 = scalar_select %p1427_p7, 1, 0 }
  0x46   : > { %p1432_p12 = pnand %p740_p2, %p231_p10  ;;  %s243_s7 = sshll.u32 %s1205_s23, 4  ;;  %s244_s7 = int_to_ptr.vmem [resolvable:$true] %s243_s7 }
  0x47   : > { %p1442_p0 = pnand %p825_p6, %p1407_p9  ;;  %s289_s3 = sand.u32 1, %s1168_s29  }
  0x48   : > { %p809_p8 = pneg %p1432_p12  ;;  %p1665_p1 = scmp.eq.s32.totalorder %s1383_s18, 0 }
  0x49   : > { %s746_s5 = sshll.u32 %s289_s3, 4  ;;  %s747_s6 = sshll.u32 %s1192_s12, 6 }
  0x4a   : > { %p1449_p3 = pnand %p809_p8, %p1665_p1  ;;  %s1005_s20 = scalar_lea.vmem %s244_s7, 256 }
  0x4b   : > { %p1006_p2 = scmp.ne.s32.totalorder %s244_s7, %s1005_s20  ;;  %p1013_p4 = scmp.lt.s32.totalorder %s244_s7, %s244_s7 }
  0x4c   : > { %p996_p5 = pneg %p1449_p3  ;;  %p1014_p6 = scmp.lt.s32.totalorder %s1005_s20, %s1005_s20 }
  0x4e   : > { %p1008_p10 = pnand %p1006_p2, %p996_p5  ;;  %p1015_p9 = por %p1014_p6, %p1013_p4 }
  0x50   : > { %p1009_p7 = pneg %p1008_p10 }
  0x52   : > { %p1016_p13 = pnand %p1015_p9, %p1009_p7 }
  0x54   : > { %1019 = shalt.err (!%p1016_p13)
}
  0x55   : > { %s1206_s21 = smov 64   ;;  %s1207_s10 = smov 4  }
  0x56   : > { %s1667_s3 = sld [smem:[#allocation27_spill]]  ;;  %s291_s1 = scalar_lea.vmem [#allocation8], %s746_s5 }
  0x57   : > { %s1668_s11 = sld [smem:[#allocation31_spill]]  ;;  %s297_s29 = sshll.u32 %s291_s1, 4  ;;  %s298_s29 = int_to_ptr.vmem [resolvable:$true] %s297_s29 }
  0x58   : > { %p1022_p8 = pneg %p1442_p0  ;;  %s1033_s20 = scalar_lea.vmem %s298_s29, 256 }
  0x59   : > { %p1034_p13 = scmp.ne.s32.totalorder %s298_s29, %s1033_s20  ;;  %s1208_s15 = smov [#allocation8]  }
  0x5a   : > { %s1038_s26 = sshll.u32 %s1208_s15, 4  ;;  %s1039_s26 = int_to_ptr.vmem [resolvable:$false] %s1038_s26 }
  0x5b   : > { %p1036_p4 = pnand %p1034_p13, %p1022_p8  ;;  %s1040_s4 = scalar_lea.vmem %s1039_s26, 512 }
  0x5c   : > { %812 = dma.hbm_to_vmem [thread:$0]  (!%p1449_p3), %s1667_s3, 256, %s244_s7, [#allocation7], %s1206_s21, %s1206_s21, %s1207_s10  }
  0x5d   : > { %s296_s9 = scalar_lea.hbm %s1668_s11, %s747_s6  ;;  %p1037_p7 = pneg %p1036_p4 }
  0x5e   : > { %p1041_p1 = scmp.lt.s32.totalorder %s298_s29, %s1039_s26  ;;  %p1042_p5 = scmp.lt.s32.totalorder %s1040_s4, %s1033_s20 }
  0x60   : > { %p1043_p3 = por %p1042_p5, %p1041_p1 }
  0x62   : > { %p1044_p2 = pnand %p1043_p3, %p1037_p7 }
  0x64   : > { %1047 = shalt.err (!%p1044_p2)
}
  0x65   : > { %s1209_s0 = smov 192   ;;  %315 = sbr.rel (%p1432_p12) target bundleno = 890 (0x37a), region = 48 }
  0x66   : > { %819 = dma.hbm_to_vmem [thread:$0]  (!%p1442_p0), %s296_s9, 256, %s298_s29, %s1375_s17, %s1209_s0, %s1206_s21, %s1207_s10  }
  0x67   : > { %s317_s11 = sand.u32 (!%p1432_p12), 1, %s1383_s18   ;;  %s319_s12 = sand.u32 (!%p1432_p12), 1, %s1176_s8  }
  0x68   : > { %s749_s13 = sshll.u32 (!%p1432_p12), %s319_s12, 4  ;;  %s318_s15 = scalar_lea.sflag (!%p1432_p12), [#allocation4], %s317_s11 }
  0x69   : > { %s321_s26 = scalar_lea.vmem (!%p1432_p12), [#allocation3], %s749_s13 }
  0x6a   : > { %1131 = dma.done.wait (%p1394_p11), %s318_s15, 256  }
  0x6b   : > { %1133 = vsyncadd (%p1394_p11), %s318_s15, 4294967040  ;;  %p1669_p10 = scmp.eq.s32.totalorder %s1383_s18, 0 }
  0x6d   : > { %1135 = dma.done.wait (%p1669_p10), [#allocation7], 256   ;;  %p1670_p0 = pmov %p1669_p10 }
  0x6e   : > { %s332_s29 = sand.u32 1, %s1164_s28   ;;  %p1671_p12 = scmp.ne.s32.totalorder %s1660_s30, 0 }
  0x6f   : > { %1137 = vsyncadd (%p1670_p0), [#allocation7], 4294967040  ;;  %s1482_s9 = sshll.u32 %s332_s29, 4 }
  0x70   : > { %s334_s17 = scalar_lea.vmem [#allocation8], %s1482_s9 }
  0x71   : > { %1139 = dma.done.wait (%p1671_p12), %s318_s15, 256  }
  0x72   : > { %1141 = vsyncadd (%p1671_p12), %s318_s15, 4294967040  ;;  %s1672_s22 = sld [smem:[#allocation17_spill]]  ;;  %s370_s1 = sand.u32 1, %s1152_s25  }
  0x73   : > { %s752_s18 = sshll.u32 %s370_s1, 4  ;;  %s1673_s5 = sld [smem:[#allocation32_spill]] }
  0x74   : > { %s1500_s21 = scalar_lea.vmem [#allocation9], %s752_s18 }
  0x78   : > { %p374_p11 = scmp.lt.s32.totalorder %s1672_s22, 2  ;;  %p753_p6 = scmp.ne.s32.totalorder %s1672_s22, 0 }
  0x79   : > { %s1674_s23 = sld [smem:[#allocation28_spill]] (!%p753_p6) }
  0x7a   : > { %s1494_s19 = scalar_select %p374_p11, %s1672_s22, 2 }
  0x7b   : > { %382 = sbr.rel (%p753_p6) target bundleno = 667 (0x29b), region = 64  ;;  %s1675_s4 = sld [smem:[#allocation29_spill]] (!%p753_p6) }
  0x7c   : > { %s376_s6 = scalar_lea.vmem %s1673_s5, %s1494_s19  ;;  %s1676_s12 = sld [smem:[#allocation30_spill]] (!%p753_p6) }
  0x80   : > { %v953_v0 = vld [vmem:[#allocation6 + $0x8] sm:$0xff]   ;;  %v1210_v1 = vmov 0.0   ;;  %v954_v2 = vld [vmem:[#allocation6] sm:$0xff]   ;;  %vm1211_vm0 = vmmov 0   ;;  %vm409_vm1 = vcmask 261120   ;;  %vm517_vm2 = vcmask 257024  }
  0x81   : > { %782 = vmatprep.subr.bf16.mxu0 %v1210_v1  ;;  %786 = vmatprep.mubr.msk.bf16.mxu0 %vm1211_vm0, %v1210_v1  ;;  %v383_v3 = vld [vmem:[%s321_s26] sm:$0xff]  ;;  %v384_v4 = vld [vmem:[%s321_s26 + $0x8] sm:$0xff] }
  0x82   : > { %783 = vmatpush3.bf16.msra.mxu0 %v953_v0  ;;  %v385_v5 = vpack.c.bf16 %v384_v4, %v383_v3  ;;  %v754_v6 = vld [vmem:[%s1674_s23] ss:$0 sm:$0xff] }
  0x83   : > { %784 = vmatprep.subr.bf16.mxu0 %v1210_v1  ;;  %v758_v42 = vld [vmem:[%s1675_s4] ss:$0 sm:$0xff] }
  0x84   : > { %v759_v44 = vld [vmem:[%s1676_s12] ss:$0 sm:$0xff] }
  0x86   : > { %785 = vmatpush3.bf16.msra.mxu0 %v954_v2 }
  0x89   : > { %787 = vmatmul.mubr.msk.bf16.vlgmr.msra.gmra.mxu0 %vm409_vm1, %v385_v5 }
 0x149   : > { %v447_v7 = vpop.f32.mrf.mxu0 }
 0x14a   : > { %v448_v8 = vadd.f32 %v754_v6, %v447_v7 }
 0x14b   : > { %v788_v9 = vpop.f32.mrf.mxu0 }
 0x14c   : > { %v456_v10 = vmul.f32 0.70710677, %v448_v8  ;;  %v454_v16 = vmul.f32 0.5, %v448_v8 }
 0x14d   : > { %v450_v11 = vpop.f32.mrf.mxu0 }
 0x14e   : > { %955 = verf.f32 %v456_v10  ;;  %v451_v12 = vadd.f32 %v754_v6, %v450_v11 }
 0x14f   : > { %v789_v13 = vpop.f32.mrf.mxu0 }
 0x150   : > { %v457_v14 = vmul.f32 0.70710677, %v451_v12  ;;  %v455_v20 = vmul.f32 0.5, %v451_v12 }
 0x152   : > { %957 = verf.f32 %v457_v14 }
 0x15b   : > { %v956_v15 = vpop.eup %955 }
 0x15c   : > { %v460_v17 = vadd.f32 1.0, %v956_v15 }
 0x15e   : > { %v462_v18 = vmul.f32 %v460_v17, %v454_v16 }
 0x15f   : > { %v958_v19 = vpop.eup %957 }
 0x160   : > { %v464_v21 = vsel %vm409_vm1, %v462_v18, 0.0  ;;  %v461_v22 = vadd.f32 1.0, %v958_v19 }
 0x161   : > { %465 = vadd.xlane.f32.xlu0 %v464_v21 }
 0x162   : > { %v463_v23 = vmul.f32 %v461_v22, %v455_v20 }
 0x164   : > { %v467_v24 = vsel %vm409_vm1, %v463_v23, 0.0 }
 0x165   : > { %468 = vadd.xlane.f32.xlu0 %v467_v24 }
 0x1ea   : > { %v466_v25 = vpop.xlane.xlu0 %465 }
 0x1eb   : > { %v471_v26 = vmul.f32 0.03125, %v466_v25 }
 0x1ed   : > { %v473_v27 = vsub.f32 %v462_v18, %v471_v26 }
 0x1ee   : > { %v469_v28 = vpop.xlane.xlu0 %468 }
 0x1ef   : > { %v472_v29 = vmul.f32 0.03125, %v469_v28  ;;  %v475_v30 = vmul.f32 %v473_v27, %v473_v27 }
 0x1f1   : > { %v474_v31 = vsub.f32 %v463_v23, %v472_v29  ;;  %v477_v32 = vsel %vm409_vm1, %v475_v30, 0.0 }
 0x1f2   : > { %478 = vadd.xlane.f32.xlu1 %v477_v32 }
 0x1f3   : > { %v476_v33 = vmul.f32 %v474_v31, %v474_v31 }
 0x1f5   : > { %v480_v34 = vsel %vm409_vm1, %v476_v33, 0.0 }
 0x1f6   : > { %481 = vadd.xlane.f32.xlu1 %v480_v34 }
 0x27b   : > { %v479_v35 = vpop.xlane.xlu1 %478 }
 0x27c   : > { %v483_v36 = vmul.f32 0.03125, %v479_v35 }
 0x27e   : > { %v485_v37 = vadd.f32 1e-12, %v483_v36 }
 0x27f   : > { %v482_v38 = vpop.xlane.xlu1 %481 }
 0x280   : > { %959 = vrsqrt.f32 %v485_v37  ;;  %v484_v39 = vmul.f32 0.03125, %v482_v38 }
 0x282   : > { %v486_v40 = vadd.f32 1e-12, %v484_v39 }
 0x284   : > { %961 = vrsqrt.f32 %v486_v40 }
 0x28d   : > { %v960_v41 = vpop.eup %959 }
 0x28e   : > { %v489_v43 = vmul.f32 %v960_v41, %v473_v27 }
 0x290   : > { %v498_v45 = vmul.f32 %v758_v42, %v489_v43 }
 0x291   : > { %v962_v46 = vpop.eup %961 }
 0x292   : > { %v507_v47 = vadd.f32 %v759_v44, %v498_v45  ;;  %v490_v48 = vmul.f32 %v962_v46, %v474_v31 }
 0x294   : > { %v774_v49 = vpack.c.bf16 %v507_v47, %v507_v47  ;;  %v499_v50 = vmul.f32 %v758_v42, %v490_v48 }
 0x296   : > { %518 = vst.msk [vmem:[#allocation2] sm:$0xf] %vm517_vm2, %v774_v49  ;;  %v508_v51 = vadd.f32 %v759_v44, %v499_v50 }
 0x298   : > { %v775_v52 = vpack.c.bf16 %v508_v51, %v508_v51 }
 0x29a   : > { %519 = vst.msk [vmem:[#allocation2 + $0x4] sm:$0xf] %vm517_vm2, %v775_v52 }
 0x29b PF: > { %s1677_s13 = sld [smem:[#allocation18_spill]]  ;;  %v963_v53 = vld [vmem:[%s334_s17 + $0x8] sm:$0xff]   ;;  %v1212_v54 = vmov 0.0   ;;  %v964_v55 = vld [vmem:[%s334_s17] sm:$0xff]   ;;  %vm1213_vm3 = vmmov 0   ;;  %vm550_vm4 = vcmask 261120  }
 0x29c   : > { %s1678_s15 = sld [smem:[#allocation17_spill]]  ;;  %790 = vmatprep.subr.bf16.mxu0 %v1212_v54  ;;  %794 = vmatprep.mubr.msk.bf16.mxu0 %vm1213_vm3, %v1212_v54  ;;  %v762_v57 = vld [vmem:[%s376_s6] ss:$0 sm:$0xff]  ;;  %s613_s17 = sshll.u32 %s1500_s21, 4  ;;  %s1535_s17 = int_to_ptr.vmem [resolvable:$true] %s613_s17 }
 0x29d   : > { %791 = vmatpush3.bf16.msra.mxu0 %v963_v53  ;;  %s1680_s30 = sld [smem:[#allocation33_spill]]  ;;  %s1540_s19 = scalar_lea.sflag [#allocation5], %s370_s1 }
 0x29e   : > { %792 = vmatprep.subr.bf16.mxu0 %v1212_v54  ;;  %s1048_s6 = scalar_lea.vmem %s1535_s17, 256  ;;  %p1682_p8 = scmp.ne.s32.totalorder %s1661_s27, 0 }
 0x29f   : > { %p1049_p9 = scmp.ne.s32.totalorder %s1535_s17, %s1048_s6  ;;  %s1214_s3 = smov [#allocation9]  }
 0x2a0   : > { %s1052_s20 = sshll.u32 %s1214_s3, 4  ;;  %s1053_s20 = int_to_ptr.vmem [resolvable:$false] %s1052_s20 }
 0x2a1   : > { %v965_v56 = vld [vmem:[#allocation2] sm:$0xff]   ;;  %793 = vmatpush3.bf16.msra.mxu0 %v964_v55  ;;  %s798_s26 = smul.u32 6, %s1677_s13  ;;  %p1050_p13 = pnand %p1049_p9, %p1682_p8 }
 0x2a2   : > { %s1054_s4 = scalar_lea.vmem %s1053_s20, 512  ;;  %p1055_p7 = scmp.lt.s32.totalorder %s1535_s17, %s1053_s20 }
 0x2a3   : > { %s610_s29 = sadd.s32 %s1678_s15, %s798_s26  ;;  %s1681_s23 = smov %s1680_s30 }
 0x2a4   : > { %795 = vmatmul.mubr.msk.bf16.vlgmr.msra.gmra.mxu0 %vm550_vm4, %v965_v56  ;;  %s770_s9 = sshll.u32 %s610_s29, 7  ;;  %p1051_p4 = pneg %p1050_p13 }
 0x2a5   : > { %s1533_s10 = scalar_lea.hbm %s1680_s30, %s770_s9  ;;  %p1056_p1 = scmp.lt.s32.totalorder %s1054_s4, %s1048_s6 }
 0x2a7   : > { %p1057_p5 = por %p1056_p1, %p1055_p7 }
 0x2a9   : > { %p1058_p3 = pnand %p1057_p5, %p1051_p4 }
 0x364   : > { %v588_v58 = vpop.f32.mrf.mxu0 }
 0x365   : > { %v589_v59 = vadd.f32 %v762_v57, %v588_v58 }
 0x366   : > { %v796_v60 = vpop.f32.mrf.mxu0 }
 0x367   : > { %595 = vst [vmem:[%s1500_s21] sm:$0xff] %v589_v59 }
 0x368   : > { %v591_v61 = vpop.f32.mrf.mxu0 }
 0x369   : > { %v592_v62 = vadd.f32 %v762_v57, %v591_v61 }
 0x36a   : > { %v797_v63 = vpop.f32.mrf.mxu0 }
 0x36b   : > { %596 = vst [vmem:[%s1500_s21 + $0x8] sm:$0xff] %v592_v62 }
 0x36c   : > { %1061 = shalt.err (!%p1058_p3)
}
 0x36d   : > { %s1062_s1 = scalar_lea.hbm %s1533_s10, 256  ;;  %s1066_s11 = scalar_lea.hbm %s1681_s23, 1536 }
 0x36e   : > { %p1063_p2 = scmp.ne.s32.totalorder %s1533_s10, %s1062_s1  ;;  %p1067_p12 = scmp.lt.s32.totalorder %s1533_s10, %s1681_s23 }
 0x36f   : > { %p1068_p11 = scmp.lt.s32.totalorder %s1066_s11, %s1062_s1 }
 0x370   : > { %p1064_p10 = pnand %p1063_p2, %p1682_p8 }
 0x371   : > { %p1069_p6 = por %p1068_p11, %p1067_p12 }
 0x372   : > { %p1065_p0 = pneg %p1064_p10 }
 0x374   : > { %p1070_p9 = pnand %p1069_p6, %p1065_p0 }
 0x376   : > { %1073 = shalt.err (!%p1070_p9)
}
 0x377   : > { %s1215_s15 = smov 128   ;;  %s1216_s26 = smov 384  }
 0x378   : > { %s1217_s29 = smov 8  }
 0x379   : > { %807 = dma.vmem_to_hbm [thread:$0]  (%p1682_p8), %s1535_s17, 256, %s1533_s10, %s1540_s19, %s1215_s15, %s1216_s26, %s1217_s29  }
 0x37a PF: > { %p827_p13 = scmp.ge.s32.totalorder %s1200_s14, 2  ;;  %s628_s22 = sand.u32 1, %s1148_s24  }
 0x37b   : > { %p1683_p4 = scmp.ne.s32.totalorder %s1662_s16, 0  ;;  %s629_s18 = scalar_lea.sflag [#allocation5], %s628_s22 }
 0x37d   : > { %p821_p7 = pnand %p827_p13, %p1683_p4 }
 0x37f   : > { %p822_p1 = pneg %p821_p7 }
 0x381   : > { %1143 = dma.done.wait (%p822_p1), %s629_s18, 256  }
 0x382   : > { %1145 = vsyncadd (%p822_p1), %s629_s18, 4294967040  ;;  %s24_s14 = sadd.s32 1, %s1200_s14   ;;  %s1685_s27 = sld [smem:[#allocation14_spill]] }
 0x383   : > { %p1568_p5 = scmp.ge.s32.totalorder %s24_s14, 8   ;;  %s1686_s26 = sld [smem:[#allocation24_spill]] }
 0x384   : > { %s1687_s9 = sld [smem:[#allocation15_spill]]  ;;  %s1695_s24 = smov %s1152_s25 }
 0x385   : > { %s1688_s29 = sld [smem:[#allocation25_spill]]  ;;  %s1699_s30 = smov %s1176_s8 }
 0x386   : > { %s1689_s17 = sld [smem:[#allocation16_spill]] }
 0x387   : > { %s1690_s16 = sld [smem:[#allocation23_spill]] }
 0x388   : > { %s1691_s10 = sld [smem:[#allocation19_spill]]  ;;  %s1696_s25 = smov %s1685_s27 }
 0x389   : > { %s1692_s11 = sld [smem:[#allocation20_spill]]  ;;  %s1697_s27 = smov %s1164_s28 }
 0x38a   : > { %s1693_s12 = sld [smem:[#allocation21_spill]]  ;;  %s1698_s28 = smov %s1687_s9 }
 0x38b   : > { %s1694_s13 = sld [smem:[#allocation22_spill]]  ;;  %23 = sbr.rel (!%p1568_p5) target bundleno = 20 (0x14), region = 115 }
 0x38c   : > { %s1700_s8 = smov %s1689_s17 }
 0x38d   : > { %s1701_s9 = smov %s1690_s16 }
 0x390   :  { %634 = vsyncpa [#allocation4], 1 }
 0x391   :  { %636 = vsyncpa [#allocation4 + $0x1], 1 }
 0x392   :  { %637 = vsyncpa [#allocation7], 1 }
 0x393   :  { %638 = vsyncpa [#allocation5], 1 }
 0x394   :  { %640 = vsyncpa [#allocation5 + $0x1], 1 }

</bundles_post_ra>
